<compile_context>
chip_gen: v5e
topology: v5e:2x2
jax: 0.10.0
libtpu: 0.0.40
codegen_flags: <defaults>
</compile_context>

<pallas_src>
import functools
import math

import jax
import jax.numpy as jnp
from jax.experimental import pallas as pl
from jax.experimental.pallas import tpu as pltpu


# -----------------------------------------------------------------------------
# Kernel
# -----------------------------------------------------------------------------
def _attention_kernel(q_ref, k_ref, v_ref,
                      wq_ref, bq_ref, wk_ref, bk_ref, wv_ref, bv_ref,
                      ctx_ref, attn_ref, *,
                      scale, compute_dtype, approx_recip, attn_out_sk):
    Bt, K, H = q_ref.shape
    _, S, _ = k_ref.shape
    cd = compute_dtype

    # Fused linear projections: one (Bt*rows, H) @ (H, H) MXU matmul each.
    # Weights were pre-transposed once in the wrapper to (in, out), so the kernel
    # never transposes W. The (Bt, rows, H) <-> (Bt*rows, H) reshapes are
    # sublane-side merges: free when rows % 8 == 0 (or rows == 1, 2-D queries).
    def project(x_ref, w_ref, b_ref, rows):
        x = x_ref[...].astype(cd).reshape(Bt * rows, H)
        y = jnp.dot(x, w_ref[...], preferred_element_type=jnp.float32)
        y = y + b_ref[...]                                   # bias added in f32
        return y.reshape(Bt, rows, H)

    q = project(q_ref, wq_ref, bq_ref, K)                    # (Bt, K, H) f32
    k = project(k_ref, wk_ref, bk_ref, S)                    # (Bt, S, H) f32
    v = project(v_ref, wv_ref, bv_ref, S)                    # (Bt, S, H) f32

    # scores[b] = (q[b] @ k[b]^T) * scale -> (Bt, K, S); softmax over S (lanes).
    scores = jax.lax.dot_general(
        q.astype(cd), k.astype(cd),
        dimension_numbers=(((2,), (2,)), ((0,), (0,))),
        preferred_element_type=jnp.float32) * scale

    # Numerically-stable softmax in f32.
    m = jnp.max(scores, axis=-1, keepdims=True)
    e = jnp.exp(scores - m)
    denom = jnp.sum(e, axis=-1, keepdims=True)
    if approx_recip:
        inv = pl.reciprocal(denom, approx=True)              # EUP slot, ~free
    else:
        inv = 1.0 / denom                                    # Bt*K divides, not Bt*K*S
    attn = e * inv                                           # (Bt, K, S) f32

    # context[b] = attn[b] @ v[b] -> (Bt, K, H)
    ctx = jax.lax.dot_general(
        attn.astype(cd), v.astype(cd),
        dimension_numbers=(((2,), (1,)), ((0,), (0,))),
        preferred_element_type=jnp.float32)

    ctx_ref[...] = ctx.astype(ctx_ref.dtype)

    if attn_out_sk:
        # K % 128 == 0: store the module's (S, K) layout directly (lane-dense
        # over K, XLU transpose has slack) -> no wrapper transpose round-trip.
        attn_ref[...] = jnp.swapaxes(attn, 1, 2).astype(attn_ref.dtype)
    else:
        # K < 128: keep (K, S) layout (lane-dense over S); wrapper permutes.
        attn_ref[...] = attn.astype(attn_ref.dtype)


# -----------------------------------------------------------------------------
# Generation-aware tiling policy
# -----------------------------------------------------------------------------
def _tpu_generation():
    try:
        kind = jax.devices()[0].device_kind.lower()
    except Exception:
        return "unknown"
    if "v7" in kind or "7x" in kind:
        return "v7x"
    if "v6" in kind:
        return "v6e"
    if "v5" in kind:
        return "v5e"
    if "v4" in kind:
        return "v4"
    return "unknown"


# (tile budget for block picker, scoped vmem_limit_bytes, prefer even #steps)
_GEN_CONFIG = {
    "v7x": (14 << 20, 44 << 20, True),    # 64 MiB VMEM/TC: stay well clear; 2 TCs
    "v6e": (28 << 20, 96 << 20, False),   # 128 MiB VMEM: big tiles amortize step cost
    "v5e": (28 << 20, 96 << 20, False),   # 128 MiB VMEM, single TC, lowest HBM BW
    "v4": (24 << 20, 64 << 20, False),
    "unknown": (12 << 20, 40 << 20, False),  # conservative, v7x-safe fallback
}


def _vmem_bytes_per_batch(K, S, H, in_itemsize, out_itemsize, compute_itemsize):
    """Per-batch-element VMEM footprint of one grid step (corrected accounting)."""
    rows_in = K + 2 * S
    dma_in = 2 * rows_in * H * in_itemsize             # double-buffered q/k/v tiles
    dma_out = 2 * (K * H + K * S) * out_itemsize       # double-buffered ctx/attn tiles
    f32_interm = (rows_in * H + 3 * K * S + K * H) * 4  # proj q/k/v, scores/e/attn, ctx
    cd_copies = (rows_in * H + K * S + K * H) * compute_itemsize  # MXU operand copies
    return dma_in + dma_out + f32_interm + cd_copies


def _pick_block_batch(B, per_batch_bytes, fixed_bytes, budget, *, prefer_even_steps):
    """Largest divisor of B whose grid step fits the budget.

    Prefers sublane-aligned tiles (Bt % 8 == 0 or Bt == B) so in-kernel reshapes
    are free; on v7x prefers an even number of grid steps (two TensorCores).
    """
    divisors = [d for d in range(1, B + 1) if B % d == 0]
    fits = [d for d in divisors if fixed_bytes + d * per_batch_bytes <= budget]
    if not fits:
        return 1
    aligned = [d for d in fits if d == B or d % 8 == 0]
    cands = aligned if aligned else fits
    if prefer_even_steps:
        even = [d for d in cands if (B // d) >= 2 and (B // d) % 2 == 0]
        if even:
            cands = even
    return max(cands)


# -----------------------------------------------------------------------------
# Wrapper
# -----------------------------------------------------------------------------
def scaled_dot_attention(queries, keys, values, params, *, fast=False, block_batch=None):
    """Pallas implementation of ScaledDotAttention.forward.

    fast=True: bf16 MXU matmuls (f32 accumulation / f32 softmax), approx
    reciprocal for the softmax normalize, bf16 outputs; bf16 activations are
    accepted directly (no extra cast pass).

    Note: in fast mode the returned context is computed from bf16-cast
    attention probabilities, so it is slightly inconsistent with the returned
    attention_weights (within bf16 precision).
    """
    if queries.ndim == 2:
        queries = queries[:, None, :]                    # (B, 1, H)
    B, K, H = queries.shape
    _, S, _ = keys.shape

    compute_dtype = jnp.bfloat16 if fast else jnp.float32
    out_dtype = jnp.bfloat16 if fast else jnp.float32
    scale = 1.0 / math.sqrt(H)                           # torch.rsqrt(hidden_size)

    # Pre-transpose weights ONCE (out,in) -> (in,out) so the kernel does x @ W;
    # cast to the matmul dtype (halves weight DMA bytes in bf16 mode).
    wq = params["wq"].T.astype(compute_dtype)
    wk = params["wk"].T.astype(compute_dtype)
    wv = params["wv"].T.astype(compute_dtype)
    bq = params["bq"].astype(jnp.float32)
    bk = params["bk"].astype(jnp.float32)
    bv = params["bv"].astype(jnp.float32)

    gen = _tpu_generation()
    budget, vmem_limit, prefer_even = _GEN_CONFIG[gen]

    in_item = jnp.dtype(queries.dtype).itemsize
    out_item = jnp.dtype(out_dtype).itemsize
    cd_item = jnp.dtype(compute_dtype).itemsize
    per_b = _vmem_bytes_per_batch(K, S, H, in_item, out_item, cd_item)
    fixed = 3 * (2 * H * H * cd_item) + 3 * (2 * H * 4)  # weights + biases (2x buffered)

    if block_batch is None:
        block_batch = _pick_block_batch(B, per_b, fixed, budget,
                                        prefer_even_steps=prefer_even)
    Bt = block_batch
    assert B % Bt == 0, f"block_batch={Bt} must divide B={B}"
    grid = (B // Bt,)

    # Attention output layout choice (module returns (B, S, K)):
    #   K % 128 == 0 -> store (B, S, K) directly from the kernel (lane-dense on K).
    #   otherwise    -> store (B, K, S) (lane-dense on S) and permute in the wrapper.
    attn_out_sk = (K % 128 == 0)

    batch_spec = lambda rows: pl.BlockSpec((Bt, rows, H), lambda b: (b, 0, 0))
    w_spec = pl.BlockSpec((H, H), lambda b: (0, 0))      # grid-invariant weights
    b_spec = pl.BlockSpec((1, H), lambda b: (0, 0))

    if attn_out_sk:
        attn_shape = (B, S, K)
        attn_spec = pl.BlockSpec((Bt, S, K), lambda b: (b, 0, 0))
    else:
        attn_shape = (B, K, S)
        attn_spec = pl.BlockSpec((Bt, K, S), lambda b: (b, 0, 0))

    kernel = functools.partial(_attention_kernel, scale=scale,
                               compute_dtype=compute_dtype, approx_recip=fast,
                               attn_out_sk=attn_out_sk)

    context, attn_raw = pl.pallas_call(
        kernel,
        out_shape=(
            jax.ShapeDtypeStruct((B, K, H), out_dtype),
            jax.ShapeDtypeStruct(attn_shape, out_dtype),
        ),
        grid_spec=pltpu.PrefetchScalarGridSpec(
            num_scalar_prefetch=0,
            grid=grid,
            in_specs=[
                batch_spec(K),           # queries
                batch_spec(S),           # keys
                batch_spec(S),           # values
                w_spec, b_spec,          # Wq^T, bq
                w_spec, b_spec,          # Wk^T, bk
                w_spec, b_spec,          # Wv^T, bv
            ],
            out_specs=[
                pl.BlockSpec((Bt, K, H), lambda b: (b, 0, 0)),   # context
                attn_spec,                                       # attention
            ],
        ),
        compiler_params=pltpu.CompilerParams(
            dimension_semantics=("parallel",),
            vmem_limit_bytes=vmem_limit,
        ),
    )(queries, keys, values, wq, bq, wk, bk, wv, bv)

    if attn_out_sk:
        attention_weights = attn_raw                    # already (B, S, K)
    else:
        attention_weights = jnp.swapaxes(attn_raw, 1, 2)  # (B, K, S) -> (B, S, K)
    return context, attention_weights


# -----------------------------------------------------------------------------
# Params / reference
# -----------------------------------------------------------------------------
def init_params(hidden_size, key):
    """Deterministic init mimicking nn.Linear's default uniform(-1/sqrt(H), 1/sqrt(H))."""
    bound = 1.0 / math.sqrt(hidden_size)
    keys = jax.random.split(key, 6)
    u = lambda k, shape: jax.random.uniform(k, shape, jnp.float32, -bound, bound)
    return {
        "wq": u(keys[0], (hidden_size, hidden_size)), "bq": u(keys[1], (1, hidden_size)),
        "wk": u(keys[2], (hidden_size, hidden_size)), "bk": u(keys[3], (1, hidden_size)),
        "wv": u(keys[4], (hidden_size, hidden_size)), "bv": u(keys[5], (1, hidden_size)),
    }


def reference(queries, keys, values, params):
    """Pure-JAX reference matching the PyTorch forward exactly."""
    if queries.ndim == 2:
        queries = queries[:, None, :]
    H = queries.shape[-1]
    scale = 1.0 / math.sqrt(H)
    q = queries @ params["wq"].T + params["bq"]
    k = keys @ params["wk"].T + params["bk"]
    v = values @ params["wv"].T + params["bv"]
    unnorm = jnp.einsum("bsh,bkh->bsk", k, q) * scale          # (B, S, K)
    attn = jax.nn.softmax(jnp.swapaxes(unnorm, 1, 2), axis=2)  # (B, K, S)
    context = jnp.einsum("bks,bsh->bkh", attn, v)              # (B, K, H)
    return context, jnp.swapaxes(attn, 1, 2)                   # (B, S, K)


# -----------------------------------------------------------------------------
# Demo / self-check
# -----------------------------------------------------------------------------
if __name__ == "__main__":
    B, K, S, H = 8, 8, 8, 32
    key = jax.random.PRNGKey(0)
    k_param, k_q, k_k, k_v = jax.random.split(key, 4)

    params = init_params(H, k_param)
    queries = jax.random.normal(k_q, (B, K, H), jnp.float32)
    keys = jax.random.normal(k_k, (B, S, H), jnp.float32)
    values = jax.random.normal(k_v, (B, S, H), jnp.float32)

    ctx_ref, attn_ref = reference(queries, keys, values, params)

    # Precise path (f32 matmuls, exact per-row reciprocal) — matches reference tightly.
    context, attn = scaled_dot_attention(queries, keys, values, params, fast=False)
    jax.block_until_ready((context, attn))
    assert context.shape == (B, K, H) and attn.shape == (B, S, K)
    assert jnp.allclose(context, ctx_ref, atol=1e-5, rtol=1e-5)
    assert jnp.allclose(attn, attn_ref, atol=1e-5, rtol=1e-5)

    # Fast path: caller provides bf16 activations, bf16 outputs, bf16 MXU matmuls
    # (f32 accumulation) + approx reciprocal — looser tolerance.
    q_bf = queries.astype(jnp.bfloat16)
    k_bf = keys.astype(jnp.bfloat16)
    v_bf = values.astype(jnp.bfloat16)
    context_f, attn_f = scaled_dot_attention(q_bf, k_bf, v_bf, params, fast=True)
    jax.block_until_ready((context_f, attn_f))
    assert context_f.shape == (B, K, H) and attn_f.shape == (B, S, K)
    assert context_f.dtype == jnp.bfloat16 and attn_f.dtype == jnp.bfloat16
    assert jnp.allclose(context_f.astype(jnp.float32), ctx_ref, atol=1e-1, rtol=1e-1)
    assert jnp.allclose(attn_f.astype(jnp.float32), attn_ref, atol=1e-1, rtol=1e-1)

    print("KERNEL_OK")
</pallas_src>

<mosaic_0001>
module attributes {stable_mosaic.version = 11 : i64} {
  func.func @_attention_kernel(%arg0: i32, %arg1: memref<8x8x32xf32, #tpu.memory_space<vmem>>, %arg2: memref<8x8x32xf32, #tpu.memory_space<vmem>>, %arg3: memref<8x8x32xf32, #tpu.memory_space<vmem>>, %arg4: memref<32x32xf32, #tpu.memory_space<vmem>>, %arg5: memref<1x32xf32, #tpu.memory_space<vmem>>, %arg6: memref<32x32xf32, #tpu.memory_space<vmem>>, %arg7: memref<1x32xf32, #tpu.memory_space<vmem>>, %arg8: memref<32x32xf32, #tpu.memory_space<vmem>>, %arg9: memref<1x32xf32, #tpu.memory_space<vmem>>, %arg10: memref<8x8x32xf32, #tpu.memory_space<vmem>>, %arg11: memref<8x8x8xf32, #tpu.memory_space<vmem>>) attributes {dimension_semantics = [#tpu.dimension_semantics<parallel>], iteration_bounds = array<i64: 1>, scalar_prefetch = 0 : i64, scratch_operands = 0 : i64, tpu.core_type = #tpu.core_type<tc>, window_params = [{transform_indices = @transform_0, window_bounds = array<i64: 8, 8, 32>}, {transform_indices = @transform_1, window_bounds = array<i64: 8, 8, 32>}, {transform_indices = @transform_2, window_bounds = array<i64: 8, 8, 32>}, {pipeline_mode = #tpu.pipeline_mode<synchronous>, transform_indices = @transform_3, window_bounds = array<i64: 32, 32>}, {pipeline_mode = #tpu.pipeline_mode<synchronous>, transform_indices = @transform_4, window_bounds = array<i64: 1, 32>}, {pipeline_mode = #tpu.pipeline_mode<synchronous>, transform_indices = @transform_5, window_bounds = array<i64: 32, 32>}, {pipeline_mode = #tpu.pipeline_mode<synchronous>, transform_indices = @transform_6, window_bounds = array<i64: 1, 32>}, {pipeline_mode = #tpu.pipeline_mode<synchronous>, transform_indices = @transform_7, window_bounds = array<i64: 32, 32>}, {pipeline_mode = #tpu.pipeline_mode<synchronous>, transform_indices = @transform_8, window_bounds = array<i64: 1, 32>}, {transform_indices = @transform_9, window_bounds = array<i64: 8, 8, 32>}, {transform_indices = @transform_10, window_bounds = array<i64: 8, 8, 8>}]} {
    %c0 = arith.constant 0 : index
    %c0_0 = arith.constant 0 : index
    %c0_1 = arith.constant 0 : index
    %0 = vector.load %arg1[%c0, %c0_0, %c0_1] : memref<8x8x32xf32, #tpu.memory_space<vmem>>, vector<8x8x32xf32>
    %1 = vector.shape_cast %0 : vector<8x8x32xf32> to vector<64x32xf32>
    %c0_2 = arith.constant 0 : index
    %c0_3 = arith.constant 0 : index
    %2 = vector.load %arg4[%c0_2, %c0_3] : memref<32x32xf32, #tpu.memory_space<vmem>>, vector<32x32xf32>
    %cst = arith.constant dense<0.000000e+00> : vector<64x32xf32>
    %3 = tpu.matmul %1, %2, %cst {dimension_numbers = #tpu.dot_dimension_numbers<[1], [0], [0], [1], [0, 0, 1, 1], [], []>} : vector<64x32xf32>, vector<32x32xf32>, vector<64x32xf32> -> vector<64x32xf32>
    %c0_4 = arith.constant 0 : index
    %c0_5 = arith.constant 0 : index
    %4 = vector.load %arg5[%c0_4, %c0_5] : memref<1x32xf32, #tpu.memory_space<vmem>>, vector<1x32xf32>
    %5 = vector.broadcast %4 : vector<1x32xf32> to vector<64x32xf32>
    %6 = arith.addf %3, %5 : vector<64x32xf32>
    %7 = vector.shape_cast %6 : vector<64x32xf32> to vector<8x8x32xf32>
    %c0_6 = arith.constant 0 : index
    %c0_7 = arith.constant 0 : index
    %c0_8 = arith.constant 0 : index
    %8 = vector.load %arg2[%c0_6, %c0_7, %c0_8] : memref<8x8x32xf32, #tpu.memory_space<vmem>>, vector<8x8x32xf32>
    %9 = vector.shape_cast %8 : vector<8x8x32xf32> to vector<64x32xf32>
    %c0_9 = arith.constant 0 : index
    %c0_10 = arith.constant 0 : index
    %10 = vector.load %arg6[%c0_9, %c0_10] : memref<32x32xf32, #tpu.memory_space<vmem>>, vector<32x32xf32>
    %cst_11 = arith.constant dense<0.000000e+00> : vector<64x32xf32>
    %11 = tpu.matmul %9, %10, %cst_11 {dimension_numbers = #tpu.dot_dimension_numbers<[1], [0], [0], [1], [0, 0, 1, 1], [], []>} : vector<64x32xf32>, vector<32x32xf32>, vector<64x32xf32> -> vector<64x32xf32>
    %c0_12 = arith.constant 0 : index
    %c0_13 = arith.constant 0 : index
    %12 = vector.load %arg7[%c0_12, %c0_13] : memref<1x32xf32, #tpu.memory_space<vmem>>, vector<1x32xf32>
    %13 = vector.broadcast %12 : vector<1x32xf32> to vector<64x32xf32>
    %14 = arith.addf %11, %13 : vector<64x32xf32>
    %15 = vector.shape_cast %14 : vector<64x32xf32> to vector<8x8x32xf32>
    %c0_14 = arith.constant 0 : index
    %c0_15 = arith.constant 0 : index
    %c0_16 = arith.constant 0 : index
    %16 = vector.load %arg3[%c0_14, %c0_15, %c0_16] : memref<8x8x32xf32, #tpu.memory_space<vmem>>, vector<8x8x32xf32>
    %17 = vector.shape_cast %16 : vector<8x8x32xf32> to vector<64x32xf32>
    %c0_17 = arith.constant 0 : index
    %c0_18 = arith.constant 0 : index
    %18 = vector.load %arg8[%c0_17, %c0_18] : memref<32x32xf32, #tpu.memory_space<vmem>>, vector<32x32xf32>
    %cst_19 = arith.constant dense<0.000000e+00> : vector<64x32xf32>
    %19 = tpu.matmul %17, %18, %cst_19 {dimension_numbers = #tpu.dot_dimension_numbers<[1], [0], [0], [1], [0, 0, 1, 1], [], []>} : vector<64x32xf32>, vector<32x32xf32>, vector<64x32xf32> -> vector<64x32xf32>
    %c0_20 = arith.constant 0 : index
    %c0_21 = arith.constant 0 : index
    %20 = vector.load %arg9[%c0_20, %c0_21] : memref<1x32xf32, #tpu.memory_space<vmem>>, vector<1x32xf32>
    %21 = vector.broadcast %20 : vector<1x32xf32> to vector<64x32xf32>
    %22 = arith.addf %19, %21 : vector<64x32xf32>
    %23 = vector.shape_cast %22 : vector<64x32xf32> to vector<8x8x32xf32>
    %cst_22 = arith.constant dense<0.000000e+00> : vector<8x8x8xf32>
    %24 = tpu.matmul %7, %15, %cst_22 {dimension_numbers = #tpu.dot_dimension_numbers<[2], [2], [1], [1], [0, 0, 0, 1, 1, 1], [0], [0]>} : vector<8x8x32xf32>, vector<8x8x32xf32>, vector<8x8x8xf32> -> vector<8x8x8xf32>
    %cst_23 = arith.constant 0.176776692 : f32
    %25 = vector.broadcast %cst_23 : f32 to vector<8x8x8xf32>
    %26 = arith.mulf %24, %25 : vector<8x8x8xf32>
    %cst_24 = arith.constant dense<0xFF800000> : vector<8x8xf32>
    %27 = vector.multi_reduction <maximumf>, %26, %cst_24 [2] : vector<8x8x8xf32> to vector<8x8xf32>
    %28 = vector.shape_cast %27 : vector<8x8xf32> to vector<8x8x1xf32>
    %29 = vector.broadcast %28 : vector<8x8x1xf32> to vector<8x8x8xf32>
    %30 = arith.subf %26, %29 : vector<8x8x8xf32>
    %31 = math.exp %30 : vector<8x8x8xf32>
    %cst_25 = arith.constant dense<0.000000e+00> : vector<8x8xf32>
    %32 = vector.multi_reduction <add>, %31, %cst_25 [2] : vector<8x8x8xf32> to vector<8x8xf32>
    %33 = vector.shape_cast %32 : vector<8x8xf32> to vector<8x8x1xf32>
    %cst_26 = arith.constant 1.000000e+00 : f32
    %34 = vector.broadcast %cst_26 : f32 to vector<8x8x1xf32>
    %35 = arith.divf %34, %33 : vector<8x8x1xf32>
    %36 = vector.broadcast %35 : vector<8x8x1xf32> to vector<8x8x8xf32>
    %37 = arith.mulf %31, %36 : vector<8x8x8xf32>
    %cst_27 = arith.constant dense<0.000000e+00> : vector<8x8x32xf32>
    %38 = tpu.matmul %37, %23, %cst_27 {dimension_numbers = #tpu.dot_dimension_numbers<[2], [1], [1], [2], [0, 0, 0, 1, 1, 2], [0], [0]>} : vector<8x8x8xf32>, vector<8x8x32xf32>, vector<8x8x32xf32> -> vector<8x8x32xf32>
    %c0_28 = arith.constant 0 : index
    %c0_29 = arith.constant 0 : index
    %c0_30 = arith.constant 0 : index
    %39 = vector.load %arg10[%c0_28, %c0_29, %c0_30] : memref<8x8x32xf32, #tpu.memory_space<vmem>>, vector<8x8x32xf32>
    tpu.vector_store %arg10[%c0_28, %c0_29, %c0_30], %38 {strides = array<i32>} : memref<8x8x32xf32, #tpu.memory_space<vmem>>, vector<8x8x32xf32>,
    %c0_31 = arith.constant 0 : index
    %c0_32 = arith.constant 0 : index
    %c0_33 = arith.constant 0 : index
    %40 = vector.load %arg11[%c0_31, %c0_32, %c0_33] : memref<8x8x8xf32, #tpu.memory_space<vmem>>, vector<8x8x8xf32>
    tpu.vector_store %arg11[%c0_31, %c0_32, %c0_33], %37 {strides = array<i32>} : memref<8x8x8xf32, #tpu.memory_space<vmem>>, vector<8x8x8xf32>,
    return
  }
  func.func @transform_0(%arg0: i32) -> (i32, i32, i32) {
    %c0_i32 = arith.constant 0 : i32
    %c0_i32_0 = arith.constant 0 : i32
    %c0_i32_1 = arith.constant 0 : i32
    return %arg0, %c0_i32, %c0_i32_0 : i32, i32, i32
  }
  func.func @transform_1(%arg0: i32) -> (i32, i32, i32) {
    %c0_i32 = arith.constant 0 : i32
    %c0_i32_0 = arith.constant 0 : i32
    %c0_i32_1 = arith.constant 0 : i32
    return %arg0, %c0_i32, %c0_i32_0 : i32, i32, i32
  }
  func.func @transform_2(%arg0: i32) -> (i32, i32, i32) {
    %c0_i32 = arith.constant 0 : i32
    %c0_i32_0 = arith.constant 0 : i32
    %c0_i32_1 = arith.constant 0 : i32
    return %arg0, %c0_i32, %c0_i32_0 : i32, i32, i32
  }
  func.func @transform_3(%arg0: i32) -> (i32, i32) {
    %c0_i32 = arith.constant 0 : i32
    %c0_i32_0 = arith.constant 0 : i32
    %c0_i32_1 = arith.constant 0 : i32
    return %c0_i32, %c0_i32_0 : i32, i32
  }
  func.func @transform_4(%arg0: i32) -> (i32, i32) {
    %c0_i32 = arith.constant 0 : i32
    %c0_i32_0 = arith.constant 0 : i32
    %c0_i32_1 = arith.constant 0 : i32
    return %c0_i32, %c0_i32_0 : i32, i32
  }
  func.func @transform_5(%arg0: i32) -> (i32, i32) {
    %c0_i32 = arith.constant 0 : i32
    %c0_i32_0 = arith.constant 0 : i32
    %c0_i32_1 = arith.constant 0 : i32
    return %c0_i32, %c0_i32_0 : i32, i32
  }
  func.func @transform_6(%arg0: i32) -> (i32, i32) {
    %c0_i32 = arith.constant 0 : i32
    %c0_i32_0 = arith.constant 0 : i32
    %c0_i32_1 = arith.constant 0 : i32
    return %c0_i32, %c0_i32_0 : i32, i32
  }
  func.func @transform_7(%arg0: i32) -> (i32, i32) {
    %c0_i32 = arith.constant 0 : i32
    %c0_i32_0 = arith.constant 0 : i32
    %c0_i32_1 = arith.constant 0 : i32
    return %c0_i32, %c0_i32_0 : i32, i32
  }
  func.func @transform_8(%arg0: i32) -> (i32, i32) {
    %c0_i32 = arith.constant 0 : i32
    %c0_i32_0 = arith.constant 0 : i32
    %c0_i32_1 = arith.constant 0 : i32
    return %c0_i32, %c0_i32_0 : i32, i32
  }
  func.func @transform_9(%arg0: i32) -> (i32, i32, i32) {
    %c0_i32 = arith.constant 0 : i32
    %c0_i32_0 = arith.constant 0 : i32
    %c0_i32_1 = arith.constant 0 : i32
    return %arg0, %c0_i32, %c0_i32_0 : i32, i32, i32
  }
  func.func @transform_10(%arg0: i32) -> (i32, i32, i32) {
    %c0_i32 = arith.constant 0 : i32
    %c0_i32_0 = arith.constant 0 : i32
    %c0_i32_1 = arith.constant 0 : i32
    return %arg0, %c0_i32, %c0_i32_0 : i32, i32, i32
  }
}

</mosaic_0001>

<bundles_post_ra>
// kernel: tpu_custom_call.1
= control target key start
LH: loop header
LB: loop body
LE: loop exit
PB: predicated region body
PF: predicated region fallthrough
CT: control target
= control target key end

     0   :  { %16 = vsyncpa [#allocation3], 0  ;;  %s1580_s0 = inlined_call_operand.hbm [shape: f32[8,8,32], index: 0, kind: input, shape index: {}]   ;;  %s1581_s1 = inlined_call_operand.hbm [shape: f32[8,8,32], index: 1, kind: input, shape index: {}]   ;;  %s1582_s2 = inlined_call_operand.hbm [shape: f32[8,8,32], index: 2, kind: input, shape index: {}]   ;;  %s1583_s3 = inlined_call_operand.hbm [shape: f32[32,32], index: 3, kind: input, shape index: {}]   ;;  %s1584_s4 = inlined_call_operand.vmem [shape: f32[1,32], index: 4, kind: input, shape index: {}]   ;;  %s1585_s5 = inlined_call_operand.hbm [shape: f32[32,32], index: 5, kind: input, shape index: {}]   ;;  %s1586_s6 = inlined_call_operand.vmem [shape: f32[1,32], index: 6, kind: input, shape index: {}]   ;;  %s1587_s7 = inlined_call_operand.hbm [shape: f32[32,32], index: 7, kind: input, shape index: {}]   ;;  %s1588_s8 = inlined_call_operand.vmem [shape: f32[1,32], index: 8, kind: input, shape index: {}]   ;;  %s1589_s9 = inlined_call_operand.hbm [shape: f32[8,8,32], index: 9, kind: output, shape index: {0}]   ;;  %s1590_s10 = inlined_call_operand.hbm [shape: f32[8,8,8], index: 10, kind: output, shape index: {1}]  }
   0x1   :  { %17 = vsyncpa [#allocation6], 0 }
   0x2   :  { %18 = vsyncpa [#allocation9], 0 }
   0x3   :  { %19 = vsyncpa [#allocation12], 0 }
   0x4   :  { %20 = vsyncpa [#allocation4], 0 }
   0x5   :  { %21 = vsyncpa [#allocation15], 0  ;;  %s39_s15 = sshll.u32 %s1581_s1, 4  ;;  %s1328_s16 = smov [#allocation5]   ;;  %s40_s15 = int_to_ptr.hbm [resolvable:$true] %s39_s15 }
   0x6   :  { %s41_s17 = sshll.u32 %s1328_s16, 4  ;;  %s65_s20 = sshll.u32 %s1583_s3, 4  ;;  %s42_s17 = int_to_ptr.vmem [resolvable:$true] %s41_s17  ;;  %s66_s20 = int_to_ptr.hbm [resolvable:$true] %s65_s20 }
   0x7   :  { %s1329_s21 = smov 128   ;;  %s1330_s22 = smov 8  }
   0x8   :  { %47 = dma.hbm_to_vmem [thread:$0]  %s40_s15, 1024, %s42_s17, [#allocation6], %s1329_s21, %s1329_s21, %s1330_s22  }
   0x9   :  { %s1331_s23 = smov [#allocation8]   ;;  %s26_s1 = sshll.u32 %s1580_s0, 4  ;;  %s27_s1 = int_to_ptr.hbm [resolvable:$true] %s26_s1 }
   0xa   :  { %s67_s24 = sshll.u32 %s1331_s23, 4  ;;  %s52_s28 = sshll.u32 %s1582_s2, 4  ;;  %s68_s24 = int_to_ptr.vmem [resolvable:$true] %s67_s24  ;;  %s53_s28 = int_to_ptr.hbm [resolvable:$true] %s52_s28 }
   0xb   :  { %73 = dma.hbm_to_vmem [thread:$0]  %s66_s20, 512, %s68_s24, [#allocation9], %s1329_s21, %s1329_s21, %s1330_s22  }
   0xc   :  { %s1332_s29 = smov [#allocation2]   ;;  %s1333_s11 = smov [#allocation7]  }
   0xd   :  { %s28_s30 = sshll.u32 %s1332_s29, 4  ;;  %s54_s0 = sshll.u32 %s1333_s11, 4  ;;  %s29_s30 = int_to_ptr.vmem [resolvable:$true] %s28_s30  ;;  %s55_s0 = int_to_ptr.vmem [resolvable:$true] %s54_s0 }
   0xe   :  { %34 = dma.hbm_to_vmem [thread:$0]  %s27_s1, 1024, %s29_s30, [#allocation3], %s1329_s21, %s1329_s21, %s1330_s22  }
   0xf   :  { %s80_s14 = sshll.u32 %s1585_s5, 4  ;;  %s95_s16 = sshll.u32 %s1587_s7, 4  ;;  %s81_s14 = int_to_ptr.hbm [resolvable:$true] %s80_s14  ;;  %s96_s16 = int_to_ptr.hbm [resolvable:$true] %s95_s16 }
  0x10   :  { %60 = dma.hbm_to_vmem [thread:$0]  %s53_s28, 1024, %s55_s0, [#allocation6], %s1329_s21, %s1329_s21, %s1330_s22  }
  0x11   :  { %s1334_s17 = smov [#allocation10]   ;;  %s1335_s19 = smov [#allocation11]  }
  0x12   :  { %s82_s18 = sshll.u32 %s1334_s17, 4  ;;  %s97_s5 = sshll.u32 %s1335_s19, 4  ;;  %s83_s18 = int_to_ptr.vmem [resolvable:$true] %s82_s18  ;;  %s98_s5 = int_to_ptr.vmem [resolvable:$true] %s97_s5 }
  0x13   :  { %88 = dma.hbm_to_vmem [thread:$0]  %s81_s14, 512, %s83_s18, [#allocation9], %s1329_s21, %s1329_s21, %s1330_s22  }
  0x14   :  { %103 = dma.hbm_to_vmem [thread:$0]  %s96_s16, 512, %s98_s5, [#allocation12], %s1329_s21, %s1329_s21, %s1330_s22  }
  0x15   :  { %1316 = dma.done.wait [#allocation3], 1024  }
  0x16   :  { %1317 = vsyncadd [#allocation3], 4294966272 }
  0x17   :  { %1318 = dma.done.wait [#allocation6], 2048  }
  0x18   :  { %1319 = vsyncadd [#allocation6], 4294965248 }
  0x19   :  { %1320 = dma.done.wait [#allocation9], 1024  }
  0x1a   :  { %1321 = vsyncadd [#allocation9], 4294966272 }
  0x1b   :  { %1322 = dma.done.wait [#allocation12], 512  }
  0x1c   :  { %1323 = vsyncadd [#allocation12], 4294966784  ;;  %v223_v0 = vld [vmem:[#allocation10 + $0x18] sm:$0xff]  ;;  %v222_v1 = vld [vmem:[#allocation10 + $0x10] sm:$0xff]  ;;  %vm146_vm0 = vcmask 261120   ;;  %vm590_vm1 = vcmask 64512  }
  0x1d   :  { %v141_v2 = vld [vmem:[#allocation8 + $0x18] sm:$0xff]  ;;  %264 = vmatpush.msra.mxu1 %v223_v0  ;;  %v140_v3 = vld [vmem:[#allocation8 + $0x10] sm:$0xff]  ;;  %v221_v4 = vld [vmem:[#allocation10 + $0x8] sm:$0xff]  ;;  %s1010_s3 = sshll.u32 %s1590_s10, 4  ;;  %s1337_s10 = smov [#allocation13]   ;;  %s1011_s3 = int_to_ptr.hbm [resolvable:$true] %s1010_s3 }
  0x1e   :  { %183 = vmatpush.msra.mxu0 %v141_v2  ;;  %v139_v5 = vld [vmem:[#allocation8 + $0x8] sm:$0xff]  ;;  %v220_v6 = vld [vmem:[#allocation10] sm:$0xff]  ;;  %v214_v12 = vld [vmem:[#allocation5 + $0x10] sm:$0xff]  ;;  %s995_s27 = sshll.u32 %s1337_s10, 4  ;;  %s997_s30 = sshll.u32 %s1589_s9, 4  ;;  %s996_s27 = int_to_ptr.vmem [resolvable:$true] %s995_s27  ;;  %s998_s30 = int_to_ptr.hbm [resolvable:$true] %s997_s30 }
  0x1f   :  { %265 = vmatpush.msra.mxu1 %v222_v1  ;;  %v138_v7 = vld [vmem:[#allocation8] sm:$0xff]  ;;  %v213_v10 = vld [vmem:[#allocation5 + $0x8] sm:$0xff]  ;;  %v132_v13 = vld [vmem:[#allocation2 + $0x10] sm:$0xff] }
  0x20   :  { %184 = vmatpush.msra.mxu0 %v140_v3  ;;  %v212_v8 = vld [vmem:[#allocation5] sm:$0xff]  ;;  %v131_v11 = vld [vmem:[#allocation2 + $0x8] sm:$0xff]  ;;  %v215_v14 = vld [vmem:[#allocation5 + $0x18] sm:$0xff] }
  0x21   :  { %266 = vmatpush.msra.mxu1 %v221_v4  ;;  %v130_v9 = vld [vmem:[#allocation2] sm:$0xff]  ;;  %v133_v15 = vld [vmem:[#allocation2 + $0x18] sm:$0xff]  ;;  %v217_v18 = vld [vmem:[#allocation5 + $0x28] sm:$0xff] }
  0x22   :  { %185 = vmatpush.msra.mxu0 %v139_v5  ;;  %v216_v16 = vld [vmem:[#allocation5 + $0x20] sm:$0xff]  ;;  %v135_v19 = vld [vmem:[#allocation2 + $0x28] sm:$0xff]  ;;  %v218_v20 = vld [vmem:[#allocation5 + $0x30] sm:$0xff] }
  0x23   :  { %267 = vmatpush.msra.mxu1 %v220_v6  ;;  %v134_v17 = vld [vmem:[#allocation2 + $0x20] sm:$0xff]  ;;  %v136_v21 = vld [vmem:[#allocation2 + $0x30] sm:$0xff]  ;;  %v219_v22 = vld [vmem:[#allocation5 + $0x38] sm:$0xff] }
  0x24   :  { %186 = vmatpush.msra.mxu0 %v138_v7  ;;  %1039 = vmatmul.msk.f32.vlgmr.msra.gmra.mxu1 %vm146_vm0, %v212_v8  ;;  %v137_v23 = vld [vmem:[#allocation2 + $0x38] sm:$0xff]  ;;  %v1089_v24 = vld [vmem:[%s1586_s6] ss:$0 sm:$0xff]  ;;  %v303_v7 = vld [vmem:[#allocation11 + $0x10] sm:$0xff] }
  0x25   :  { %1031 = vmatmul.msk.f32.vlgmr.msra.gmra.mxu0 %vm146_vm0, %v130_v9  ;;  %v1090_v25 = vld [vmem:[%s1584_s4] ss:$0 sm:$0xff]  ;;  %v304_v6 = vld [vmem:[#allocation11 + $0x18] sm:$0xff]  ;;  %v302_v8 = vld [vmem:[#allocation11 + $0x8] sm:$0xff] }
  0x26   :  { %345 = vmatpush.msra.mxu2 %v304_v6 }
  0x28   :  { %346 = vmatpush.msra.mxu2 %v303_v7 }
  0x2a   :  { %347 = vmatpush.msra.mxu2 %v302_v8 }
  0x2c   :  { %1040 = vmatmul.msk.f32.gmra.mxu1 %vm146_vm0, %v213_v10  ;;  %v301_v10 = vld [vmem:[#allocation11] sm:$0xff] }
  0x2d   :  { %1032 = vmatmul.msk.f32.gmra.mxu0 %vm146_vm0, %v131_v11  ;;  %348 = vmatpush.msra.mxu2 %v301_v10 }
  0x34   :  { %1041 = vmatmul.msk.f32.gmra.mxu1 %vm146_vm0, %v214_v12  ;;  %v293_v12 = vld [vmem:[#allocation7] sm:$0xff] }
  0x35   :  { %1033 = vmatmul.msk.f32.gmra.mxu0 %vm146_vm0, %v132_v13  ;;  %1047 = vmatmul.msk.f32.vlgmr.msra.gmra.mxu2 %vm146_vm0, %v293_v12 }
  0x3c   :  { %1042 = vmatmul.msk.f32.gmra.mxu1 %vm146_vm0, %v215_v14 }
  0x3d   :  { %1034 = vmatmul.msk.f32.gmra.mxu0 %vm146_vm0, %v133_v15 }
  0x44   :  { %1043 = vmatmul.msk.f32.gmra.mxu1 %vm146_vm0, %v216_v16  ;;  %v294_v16 = vld [vmem:[#allocation7 + $0x8] sm:$0xff] }
  0x45   :  { %1035 = vmatmul.msk.f32.gmra.mxu0 %vm146_vm0, %v134_v17  ;;  %1048 = vmatmul.msk.f32.gmra.mxu2 %vm146_vm0, %v294_v16 }
  0x4c   :  { %1044 = vmatmul.msk.f32.gmra.mxu1 %vm146_vm0, %v217_v18 }
  0x4d   :  { %1036 = vmatmul.msk.f32.gmra.mxu0 %vm146_vm0, %v135_v19 }
  0x54   :  { %1045 = vmatmul.msk.f32.gmra.mxu1 %vm146_vm0, %v218_v20  ;;  %v295_v20 = vld [vmem:[#allocation7 + $0x10] sm:$0xff] }
  0x55   :  { %1037 = vmatmul.msk.f32.gmra.mxu0 %vm146_vm0, %v136_v21  ;;  %1049 = vmatmul.msk.f32.gmra.mxu2 %vm146_vm0, %v295_v20 }
  0x5c   :  { %1046 = vmatmul.msk.f32.gmra.mxu1 %vm146_vm0, %v219_v22 }
  0x5d   :  { %1038 = vmatmul.msk.f32.gmra.mxu0 %vm146_vm0, %v137_v23 }
  0xa1   :  { %v269_v26 = vpop.f32.mrf.mxu1 }
  0xa2   :  { %v188_v27 = vpop.f32.mrf.mxu0  ;;  %v270_v28 = vadd.f32 %v1089_v24, %v269_v26 }
  0xa3   :  { %v189_v29 = vadd.f32 %v1090_v25, %v188_v27 }
  0xa4   :  { %1055 = vmatpush.xpose.msk.msra.mxu3 %vm146_vm0, %v270_v28 }
  0xa7   :  { %1056 = vmatmul.msk.f32.vlgmr.msra.gmra.mxu3 %vm146_vm0, %v189_v29 }
  0xa9   :  { %v272_v30 = vpop.f32.mrf.mxu1 }
  0xaa   :  { %v191_v31 = vpop.f32.mrf.mxu0  ;;  %v273_v32 = vadd.f32 %v1089_v24, %v272_v30 }
  0xab   :  { %v192_v33 = vadd.f32 %v1090_v25, %v191_v31 }
  0xac   :  { %1057 = vmatpush.xpose.msk.msrb.mxu3 %vm146_vm0, %v273_v32 }
  0xaf   :  { %1058 = vmatmul.msk.f32.vlgmr.msrb.gmra.mxu3 %vm146_vm0, %v192_v33 }
  0xb1   :  { %v275_v34 = vpop.f32.mrf.mxu1 }
  0xb2   :  { %v194_v35 = vpop.f32.mrf.mxu0  ;;  %v276_v36 = vadd.f32 %v1089_v24, %v275_v34  ;;  %v297_v34 = vld [vmem:[#allocation7 + $0x20] sm:$0xff] }
  0xb3   :  { %v195_v37 = vadd.f32 %v1090_v25, %v194_v35 }
  0xb4   :  { %1059 = vmatpush.xpose.msk.msra.mxu3 %vm146_vm0, %v276_v36 }
  0xb7   :  { %1060 = vmatmul.msk.f32.vlgmr.msra.gmra.mxu3 %vm146_vm0, %v195_v37 }
  0xb9   :  { %v278_v38 = vpop.f32.mrf.mxu1 }
  0xba   :  { %v197_v39 = vpop.f32.mrf.mxu0  ;;  %v279_v40 = vadd.f32 %v1089_v24, %v278_v38 }
  0xbb   :  { %v198_v41 = vadd.f32 %v1090_v25, %v197_v39 }
  0xbc   :  { %1061 = vmatpush.xpose.msk.msrb.mxu3 %vm146_vm0, %v279_v40  ;;  %v298_v40 = vld [vmem:[#allocation7 + $0x28] sm:$0xff] }
  0xbf   :  { %1062 = vmatmul.msk.f32.vlgmr.msrb.gmra.mxu3 %vm146_vm0, %v198_v41 }
  0xc1   :  { %v281_v42 = vpop.f32.mrf.mxu1 }
  0xc2   :  { %v200_v43 = vpop.f32.mrf.mxu0  ;;  %v282_v44 = vadd.f32 %v1089_v24, %v281_v42 }
  0xc3   :  { %v201_v45 = vadd.f32 %v1090_v25, %v200_v43 }
  0xc4   :  { %1063 = vmatpush.xpose.msk.msra.mxu3 %vm146_vm0, %v282_v44 }
  0xc7   :  { %1064 = vmatmul.msk.f32.vlgmr.msra.gmra.mxu3 %vm146_vm0, %v201_v45 }
  0xc9   :  { %v284_v46 = vpop.f32.mrf.mxu1 }
  0xca   :  { %v203_v47 = vpop.f32.mrf.mxu0  ;;  %v285_v48 = vadd.f32 %v1089_v24, %v284_v46  ;;  %v299_v46 = vld [vmem:[#allocation7 + $0x30] sm:$0xff] }
  0xcb   :  { %v204_v49 = vadd.f32 %v1090_v25, %v203_v47 }
  0xcc   :  { %1065 = vmatpush.xpose.msk.msrb.mxu3 %vm146_vm0, %v285_v48 }
  0xcf   :  { %1066 = vmatmul.msk.f32.vlgmr.msrb.gmra.mxu3 %vm146_vm0, %v204_v49  ;;  %v300_v49 = vld [vmem:[#allocation7 + $0x38] sm:$0xff] }
  0xd1   :  { %v287_v50 = vpop.f32.mrf.mxu1 }
  0xd2   :  { %v206_v51 = vpop.f32.mrf.mxu0  ;;  %v288_v52 = vadd.f32 %v1089_v24, %v287_v50 }
  0xd3   :  { %v207_v53 = vadd.f32 %v1090_v25, %v206_v51 }
  0xd4   :  { %1067 = vmatpush.xpose.msk.msra.mxu3 %vm146_vm0, %v288_v52 }
  0xd7   :  { %1068 = vmatmul.msk.f32.vlgmr.msra.gmra.mxu3 %vm146_vm0, %v207_v53 }
  0xd9   :  { %v290_v54 = vpop.f32.mrf.mxu1 }
  0xda   :  { %v209_v55 = vpop.f32.mrf.mxu0  ;;  %v291_v56 = vadd.f32 %v1089_v24, %v290_v54 }
  0xdb   :  { %v210_v57 = vadd.f32 %v1090_v25, %v209_v55  ;;  %v296_v25 = vld [vmem:[#allocation7 + $0x18] sm:$0xff] }
  0xdc   :  { %1069 = vmatpush.xpose.msk.msrb.mxu3 %vm146_vm0, %v291_v56  ;;  %1050 = vmatmul.msk.f32.gmra.mxu2 %vm146_vm0, %v296_v25 }
  0xdf   :  { %1070 = vmatmul.msk.f32.vlgmr.msrb.gmra.mxu3 %vm146_vm0, %v210_v57 }
  0xe4   :  { %1051 = vmatmul.msk.f32.gmra.mxu2 %vm146_vm0, %v297_v34 }
  0xec   :  { %1052 = vmatmul.msk.f32.gmra.mxu2 %vm146_vm0, %v298_v40 }
  0xf4   :  { %1053 = vmatmul.msk.f32.gmra.mxu2 %vm146_vm0, %v299_v46 }
  0xfc   :  { %1054 = vmatmul.msk.f32.gmra.mxu2 %vm146_vm0, %v300_v49 }
 0x12a   :  { %v397_v58 = vpop.f32.mrf.mxu3 }
 0x12b   :  { %v582_v59 = vmul.f32 0.17677669, %v397_v58  ;;  %v1512_v58 = vld [vmem:[%s1588_s8] ss:$0 sm:$0xff]  ;;  %s1336_s8 = smov [#allocation14]  }
 0x12c   :  { %s1008_s25 = sshll.u32 %s1336_s8, 4  ;;  %s1009_s25 = int_to_ptr.vmem [resolvable:$true] %s1008_s25 }
 0x12d   :  { %v591_v60 = vsel %vm590_vm1, %v582_v59, -inf }
 0x12e   :  { %592 = vmax.xlane.f32.xlu0 %v591_v60  ;;  %v350_v60 = vpop.f32.mrf.mxu2 }
 0x132   :  { %v423_v61 = vpop.f32.mrf.mxu3 }
 0x133   :  { %v583_v62 = vmul.f32 0.17677669, %v423_v61 }
 0x135   :  { %v594_v63 = vsel %vm590_vm1, %v583_v62, -inf }
 0x136   :  { %595 = vmax.xlane.f32.xlu1 %v594_v63 }
 0x13a   :  { %v449_v0 = vpop.f32.mrf.mxu3 }
 0x13b   :  { %v584_v1 = vmul.f32 0.17677669, %v449_v0 }
 0x13d   :  { %v597_v2 = vsel %vm590_vm1, %v584_v1, -inf }
 0x13e   :  { %598 = vmax.xlane.f32.xlu1 %v597_v2 }
 0x142   :  { %v475_v3 = vpop.f32.mrf.mxu3 }
 0x143   :  { %v585_v4 = vmul.f32 0.17677669, %v475_v3  ;;  %v353_v3 = vpop.f32.mrf.mxu2 }
 0x145   :  { %v600_v5 = vsel %vm590_vm1, %v585_v4, -inf }
 0x146   :  { %601 = vmax.xlane.f32.xlu0 %v600_v5  ;;  %v354_v5 = vadd.f32 %v1512_v58, %v353_v3 }
 0x148   :  { %832 = vmatpush.msrb.mxu0 %v354_v5 }
 0x14a   :  { %v501_v9 = vpop.f32.mrf.mxu3 }
 0x14b   :  { %v586_v11 = vmul.f32 0.17677669, %v501_v9  ;;  %v356_v9 = vpop.f32.mrf.mxu2 }
 0x14c   :  { %v357_v10 = vadd.f32 %v1512_v58, %v356_v9 }
 0x14d   :  { %v603_v13 = vsel %vm590_vm1, %v586_v11, -inf }
 0x14e   :  { %604 = vmax.xlane.f32.xlu2 %v603_v13  ;;  %855 = vmatpush.msrb.mxu1 %v357_v10 }
 0x152   :  { %v527_v14 = vpop.f32.mrf.mxu3 }
 0x153   :  { %v587_v15 = vmul.f32 0.17677669, %v527_v14 }
 0x155   :  { %v606_v17 = vsel %vm590_vm1, %v587_v15, -inf }
 0x156   :  { %607 = vmax.xlane.f32.xlu0 %v606_v17 }
 0x15a   :  { %v553_v18 = vpop.f32.mrf.mxu3 }
 0x15b   :  { %v1475_v19 = vmul.f32 0.17677669, %v553_v18 }
 0x15d   :  { %v609_v21 = vsel %vm590_vm1, %v1475_v19, -inf }
 0x15e   :  { %610 = vmax.xlane.f32.xlu1 %v609_v21 }
 0x15f   :  { %v359_v13 = vpop.f32.mrf.mxu2 }
 0x160   :  { %v360_v14 = vadd.f32 %v1512_v58, %v359_v13 }
 0x162   :  { %v579_v22 = vpop.f32.mrf.mxu3  ;;  %878 = vmatpush.msrb.mxu2 %v360_v14 }
 0x163   :  { %v1480_v23 = vmul.f32 0.17677669, %v579_v22 }
 0x165   :  { %v612_v24 = vsel %vm590_vm1, %v1480_v23, -inf }
 0x166   :  { %613 = vmax.xlane.f32.xlu2 %v612_v24 }
 0x1a1   :  { %v593_v26 = vpop.xlane.xlu0 %592 }
 0x1a2   :  { %v615_v27 = vsub.f32 %v582_v59, %v593_v26 }
 0x1a4   :  { %v623_v28 = vmul.f32 1.442695, %v615_v27 }
 0x1a6   :  { %1092 = vpow2.f32 %v623_v28 }
 0x1a9   :  { %v596_v29 = vpop.xlane.xlu1 %595 }
 0x1aa   :  { %v616_v30 = vsub.f32 %v583_v62, %v596_v29  ;;  %v351_v62 = vadd.f32 %v1512_v58, %v350_v60 }
 0x1ac   :  { %v1485_v31 = vpop.eup %1092  ;;  %v625_v32 = vmul.f32 1.442695, %v616_v30  ;;  %809 = vmatpush.msra.mxu3 %v351_v62  ;;  %v362_v30 = vpop.f32.mrf.mxu2 }
 0x1ad   :  { %v639_v33 = vsel %vm590_vm1, %v1485_v31, 0.0  ;;  %v363_v34 = vadd.f32 %v1512_v58, %v362_v30 }
 0x1ae   :  { %1094 = vpow2.f32 %v625_v32  ;;  %640 = vadd.xlane.f32.xlu2 %v639_v33 }
 0x1af   :  { %901 = vmatpush.msrb.mxu3 %v363_v34 }
 0x1b1   :  { %v599_v35 = vpop.xlane.xlu1 %598 }
 0x1b2   :  { %v617_v36 = vsub.f32 %v584_v1, %v599_v35 }
 0x1b4   :  { %v1490_v37 = vpop.eup %1094  ;;  %v627_v38 = vmul.f32 1.442695, %v617_v36 }
 0x1b5   :  { %v642_v39 = vsel %vm590_vm1, %v1490_v37, 0.0 }
 0x1b6   :  { %1096 = vpow2.f32 %v627_v38  ;;  %643 = vadd.xlane.f32.xlu1 %v642_v39 }
 0x1b9   :  { %v602_v41 = vpop.xlane.xlu0 %601 }
 0x1ba   :  { %v618_v42 = vsub.f32 %v585_v4, %v602_v41 }
 0x1bc   :  { %v1495_v43 = vpop.eup %1096  ;;  %v629_v44 = vmul.f32 1.442695, %v618_v42 }
 0x1bd   :  { %v645_v45 = vsel %vm590_vm1, %v1495_v43, 0.0 }
 0x1be   :  { %1098 = vpow2.f32 %v629_v44  ;;  %646 = vadd.xlane.f32.xlu2 %v645_v45 }
 0x1c1   :  { %v605_v47 = vpop.xlane.xlu2 %604 }
 0x1c2   :  { %v619_v48 = vsub.f32 %v586_v11, %v605_v47 }
 0x1c4   :  { %v1500_v50 = vpop.eup %1098  ;;  %v631_v51 = vmul.f32 1.442695, %v619_v48 }
 0x1c5   :  { %v648_v52 = vsel %vm590_vm1, %v1500_v50, 0.0 }
 0x1c6   :  { %1100 = vpow2.f32 %v631_v51  ;;  %649 = vadd.xlane.f32.xlu0 %v648_v52 }
 0x1c9   :  { %v608_v53 = vpop.xlane.xlu0 %607 }
 0x1ca   :  { %v620_v54 = vsub.f32 %v587_v15, %v608_v53 }
 0x1cc   :  { %v1505_v55 = vpop.eup %1100  ;;  %v633_v56 = vmul.f32 1.442695, %v620_v54 }
 0x1cd   :  { %v651_v57 = vsel %vm590_vm1, %v1505_v55, 0.0 }
 0x1ce   :  { %1102 = vpow2.f32 %v633_v56  ;;  %652 = vadd.xlane.f32.xlu0 %v651_v57 }
 0x1d1   :  { %v611_v59 = vpop.xlane.xlu1 %610 }
 0x1d2   :  { %v621_v61 = vsub.f32 %v1475_v19, %v611_v59 }
 0x1d4   :  { %v1516_v63 = vpop.eup %1102  ;;  %v635_v0 = vmul.f32 1.442695, %v621_v61 }
 0x1d5   :  { %v654_v1 = vsel %vm590_vm1, %v1516_v63, 0.0 }
 0x1d6   :  { %1104 = vpow2.f32 %v635_v0  ;;  %655 = vadd.xlane.f32.xlu2 %v654_v1 }
 0x1d9   :  { %v614_v2 = vpop.xlane.xlu2 %613 }
 0x1da   :  { %v622_v4 = vsub.f32 %v1480_v23, %v614_v2 }
 0x1dc   :  { %v1522_v6 = vpop.eup %1104  ;;  %v637_v7 = vmul.f32 1.442695, %v622_v4 }
 0x1dd   :  { %v657_v8 = vsel %vm590_vm1, %v1522_v6, 0.0 }
 0x1de   :  { %1106 = vpow2.f32 %v637_v7  ;;  %658 = vadd.xlane.f32.xlu0 %v657_v8 }
 0x1e4   :  { %v1527_v11 = vpop.eup %1106 }
 0x1e5   :  { %v660_v12 = vsel %vm590_vm1, %v1527_v11, 0.0 }
 0x1e6   :  { %661 = vadd.xlane.f32.xlu1 %v660_v12 }
 0x221   :  { %v641_v15 = vpop.xlane.xlu2 %640 }
 0x222   :  { %1108 = vrcp.f32 %v641_v15  ;;  %v674_v20 = vand.u32 2147483648, %v641_v15  ;;  %v672_v22 = vand.u32 2147483647, %v641_v15  ;;  %vm668_vm3 = vweird.f32 %v641_v15 }
 0x224   :  { %v675_v25 = vor.u32 1.1754944e-38, %v674_v20  ;;  %vm673_vm5 = vcmp.eq.f32.partialorder %v672_v22, 8.507059e+37 }
 0x228   :  { %v1109_v16 = vpop.eup %1108 }
 0x229   :  { %v664_v17 = vmul.f32 %v1109_v16, %v641_v15  ;;  %v644_v18 = vpop.xlane.xlu1 %643  ;;  %vm669_vm2 = vweird.f32 %v1109_v16 }
 0x22a   :  { %1110 = vrcp.f32 %v644_v18  ;;  %vm670_vm4 = vmor %vm668_vm3, %vm669_vm2  ;;  %v689_v36 = vand.u32 2147483648, %v644_v18  ;;  %v687_v38 = vand.u32 2147483647, %v644_v18  ;;  %vm683_vm7 = vweird.f32 %v644_v18 }
 0x22b   :  { %v665_v19 = vsub.f32 1.0, %v664_v17 }
 0x22c   :  { %v690_v41 = vor.u32 1.1754944e-38, %v689_v36  ;;  %vm688_vm9 = vcmp.eq.f32.partialorder %v687_v38, 8.507059e+37 }
 0x22d   :  { %v666_v21 = vmul.f32 %v1109_v16, %v665_v19 }
 0x22f   :  { %v667_v23 = vadd.f32 %v1109_v16, %v666_v21 }
 0x230   :  { %v1111_v24 = vpop.eup %1110 }
 0x231   :  { %v671_v26 = vsel %vm670_vm4, %v1109_v16, %v667_v23  ;;  %v679_v27 = vmul.f32 %v1111_v24, %v644_v18  ;;  %v647_v28 = vpop.xlane.xlu2 %646  ;;  %vm684_vm6 = vweird.f32 %v1111_v24 }
 0x232   :  { %v676_v29 = vsel %vm673_vm5, %v675_v25, %v671_v26  ;;  %1112 = vrcp.f32 %v647_v28  ;;  %vm685_vm8 = vmor %vm683_vm7, %vm684_vm6  ;;  %v704_v52 = vand.u32 2147483648, %v647_v28  ;;  %v702_v53 = vand.u32 2147483647, %v647_v28 }
 0x233   :  { %v680_v32 = vsub.f32 1.0, %v679_v27  ;;  %v783_v33 = vmul.f32 %v1485_v31, %v676_v29  ;;  %v365_v31 = vpop.f32.mrf.mxu2  ;;  %vm698_vm11 = vweird.f32 %v647_v28 }
 0x234   :  { %v366_v48 = vadd.f32 %v1512_v58, %v365_v31  ;;  %v705_v57 = vor.u32 1.1754944e-38, %v704_v52  ;;  %vm703_vm13 = vcmp.eq.f32.partialorder %v702_v53, 8.507059e+37 }
 0x235   :  { %v681_v35 = vmul.f32 %v1111_v24, %v680_v32  ;;  %1071 = vmatmul.msk.f32.vlgmr.msra.gmra.mxu3 %vm590_vm1, %v783_v33  ;;  %983 = vst.msk [vmem:[#allocation14] sm:$0xff] %vm590_vm1, %v783_v33 }
 0x236   :  { %924 = vmatpush.msra.mxu0 %v366_v48 }
 0x237   :  { %v682_v39 = vadd.f32 %v1111_v24, %v681_v35 }
 0x238   :  { %v1113_v40 = vpop.eup %1112 }
 0x239   :  { %v694_v42 = vmul.f32 %v1113_v40, %v647_v28  ;;  %v650_v44 = vpop.xlane.xlu0 %649  ;;  %v686_v45 = vsel %vm685_vm8, %v1111_v24, %v682_v39  ;;  %vm699_vm10 = vweird.f32 %v1113_v40 }
 0x23a   :  { %1114 = vrcp.f32 %v650_v44  ;;  %v691_v47 = vsel %vm688_vm9, %v690_v41, %v686_v45  ;;  %vm700_vm12 = vmor %vm698_vm11, %vm699_vm10  ;;  %v719_v4 = vand.u32 2147483648, %v650_v44  ;;  %v717_v5 = vand.u32 2147483647, %v650_v44 }
 0x23b   :  { %v695_v46 = vsub.f32 1.0, %v694_v42  ;;  %v784_v49 = vmul.f32 %v1490_v37, %v691_v47  ;;  %v368_v37 = vpop.f32.mrf.mxu2  ;;  %vm713_vm15 = vweird.f32 %v650_v44 }
 0x23c   :  { %v369_v1 = vadd.f32 %v1512_v58, %v368_v37  ;;  %v720_v9 = vor.u32 1.1754944e-38, %v719_v4  ;;  %vm718_vm3 = vcmp.eq.f32.partialorder %v717_v5, 8.507059e+37 }
 0x23d   :  { %v696_v51 = vmul.f32 %v1113_v40, %v695_v46  ;;  %1072 = vmatmul.msk.f32.vlgmr.msrb.gmra.mxu0 %vm590_vm1, %v784_v49  ;;  %984 = vst.msk [vmem:[#allocation14 + $0x8] sm:$0xff] %vm590_vm1, %v784_v49 }
 0x23e   :  { %947 = vmatpush.msra.mxu1 %v369_v1 }
 0x23f   :  { %v697_v54 = vadd.f32 %v1113_v40, %v696_v51 }
 0x240   :  { %v1115_v56 = vpop.eup %1114 }
 0x241   :  { %v709_v59 = vmul.f32 %v1115_v56, %v650_v44  ;;  %v653_v60 = vpop.xlane.xlu0 %652  ;;  %v701_v61 = vsel %vm700_vm12, %v1113_v40, %v697_v54  ;;  %vm714_vm14 = vweird.f32 %v1115_v56 }
 0x242   :  { %1116 = vrcp.f32 %v653_v60  ;;  %v706_v0 = vsel %vm703_vm13, %v705_v57, %v701_v61  ;;  %vm715_vm2 = vmor %vm713_vm15, %vm714_vm14  ;;  %v734_v17 = vand.u32 2147483648, %v653_v60  ;;  %v732_v20 = vand.u32 2147483647, %v653_v60 }
 0x243   :  { %v710_v62 = vsub.f32 1.0, %v709_v59  ;;  %v785_v2 = vmul.f32 %v1495_v43, %v706_v0  ;;  %v371_v43 = vpop.f32.mrf.mxu2  ;;  %vm728_vm5 = vweird.f32 %v653_v60 }
 0x244   :  { %v372_v16 = vadd.f32 %v1512_v58, %v371_v43  ;;  %v735_v23 = vor.u32 1.1754944e-38, %v734_v17  ;;  %vm733_vm7 = vcmp.eq.f32.partialorder %v732_v20, 8.507059e+37 }
 0x245   :  { %v711_v3 = vmul.f32 %v1115_v56, %v710_v62  ;;  %1073 = vmatmul.msk.f32.vlgmr.msrb.gmra.mxu1 %vm590_vm1, %v785_v2  ;;  %985 = vst.msk [vmem:[#allocation14 + $0x10] sm:$0xff] %vm590_vm1, %v785_v2 }
 0x246   :  { %970 = vmatpush.msra.mxu2 %v372_v16 }
 0x247   :  { %v712_v7 = vadd.f32 %v1115_v56, %v711_v3 }
 0x248   :  { %v1117_v8 = vpop.eup %1116 }
 0x249   :  { %v724_v10 = vmul.f32 %v1117_v8, %v653_v60  ;;  %v656_v12 = vpop.xlane.xlu2 %655  ;;  %v716_v13 = vsel %vm715_vm2, %v1115_v56, %v712_v7  ;;  %vm729_vm4 = vweird.f32 %v1117_v8 }
 0x24a   :  { %1118 = vrcp.f32 %v656_v12  ;;  %v721_v15 = vsel %vm718_vm3, %v720_v9, %v716_v13  ;;  %vm730_vm6 = vmor %vm728_vm5, %vm729_vm4  ;;  %v749_v28 = vand.u32 2147483648, %v656_v12  ;;  %v747_v30 = vand.u32 2147483647, %v656_v12 }
 0x24b   :  { %v725_v14 = vsub.f32 1.0, %v724_v10  ;;  %v786_v18 = vmul.f32 %v1500_v50, %v721_v15  ;;  %vm743_vm9 = vweird.f32 %v656_v12 }
 0x24c   :  { %v750_v34 = vor.u32 1.1754944e-38, %v749_v28  ;;  %vm748_vm11 = vcmp.eq.f32.partialorder %v747_v30, 8.507059e+37 }
 0x24d   :  { %v726_v19 = vmul.f32 %v1117_v8, %v725_v14  ;;  %1074 = vmatmul.msk.f32.vlgmr.msrb.gmra.mxu2 %vm590_vm1, %v786_v18  ;;  %986 = vst.msk [vmem:[#allocation14 + $0x18] sm:$0xff] %vm590_vm1, %v786_v18 }
 0x24f   :  { %v727_v21 = vadd.f32 %v1117_v8, %v726_v19 }
 0x250   :  { %v1119_v22 = vpop.eup %1118 }
 0x251   :  { %v731_v24 = vsel %vm730_vm6, %v1117_v8, %v727_v21  ;;  %v739_v25 = vmul.f32 %v1119_v22, %v656_v12  ;;  %v659_v58 = vpop.xlane.xlu0 %658  ;;  %vm744_vm8 = vweird.f32 %v1119_v22 }
 0x252   :  { %v736_v26 = vsel %vm733_vm7, %v735_v23, %v731_v24  ;;  %1120 = vrcp.f32 %v659_v58  ;;  %vm745_vm10 = vmor %vm743_vm9, %vm744_vm8  ;;  %v764_v41 = vand.u32 2147483648, %v659_v58  ;;  %v762_v44 = vand.u32 2147483647, %v659_v58 }
 0x253   :  { %v740_v50 = vsub.f32 1.0, %v739_v25  ;;  %v787_v27 = vmul.f32 %v1505_v55, %v736_v26  ;;  %vm758_vm13 = vweird.f32 %v659_v58 }
 0x254   :  { %v765_v46 = vor.u32 1.1754944e-38, %v764_v41  ;;  %vm763_vm15 = vcmp.eq.f32.partialorder %v762_v44, 8.507059e+37 }
 0x255   :  { %v741_v29 = vmul.f32 %v1119_v22, %v740_v50  ;;  %1075 = vmatmul.msk.f32.vlgmr.msrb.gmra.mxu3 %vm590_vm1, %v787_v27  ;;  %987 = vst.msk [vmem:[#allocation14 + $0x20] sm:$0xff] %vm590_vm1, %v787_v27 }
 0x257   :  { %v742_v32 = vadd.f32 %v1119_v22, %v741_v29 }
 0x258   :  { %v1121_v33 = vpop.eup %1120 }
 0x259   :  { %v746_v35 = vsel %vm745_vm10, %v1119_v22, %v742_v32  ;;  %v754_v36 = vmul.f32 %v1121_v33, %v659_v58  ;;  %v662_v38 = vpop.xlane.xlu1 %661  ;;  %vm759_vm12 = vweird.f32 %v1121_v33 }
 0x25a   :  { %v751_v39 = vsel %vm748_vm11, %v750_v34, %v746_v35  ;;  %1122 = vrcp.f32 %v662_v38  ;;  %vm760_vm14 = vmor %vm758_vm13, %vm759_vm12  ;;  %v779_v52 = vand.u32 2147483648, %v662_v38  ;;  %v777_v54 = vand.u32 2147483647, %v662_v38 }
 0x25b   :  { %v788_v55 = vmul.f32 %v1516_v63, %v751_v39  ;;  %v755_v40 = vsub.f32 1.0, %v754_v36  ;;  %vm773_vm3 = vweird.f32 %v662_v38 }
 0x25c   :  { %v780_v57 = vor.u32 1.1754944e-38, %v779_v52  ;;  %vm778_vm5 = vcmp.eq.f32.partialorder %v777_v54, 8.507059e+37 }
 0x25d   :  { %988 = vst.msk [vmem:[#allocation14 + $0x28] sm:$0xff] %vm590_vm1, %v788_v55  ;;  %v756_v42 = vmul.f32 %v1121_v33, %v755_v40  ;;  %1076 = vmatmul.msk.f32.vlgmr.msra.gmra.mxu0 %vm590_vm1, %v788_v55 }
 0x25f   :  { %v757_v45 = vadd.f32 %v1121_v33, %v756_v42 }
 0x260   :  { %v1123_v31 = vpop.eup %1122 }
 0x261   :  { %v761_v47 = vsel %vm760_vm14, %v1121_v33, %v757_v45  ;;  %v769_v48 = vmul.f32 %v1123_v31, %v662_v38  ;;  %vm774_vm2 = vweird.f32 %v1123_v31 }
 0x262   :  { %v766_v49 = vsel %vm763_vm15, %v765_v46, %v761_v47  ;;  %vm775_vm4 = vmor %vm773_vm3, %vm774_vm2 }
 0x263   :  { %v789_v63 = vmul.f32 %v1522_v6, %v766_v49  ;;  %v770_v51 = vsub.f32 1.0, %v769_v48 }
 0x265   :  { %989 = vst.msk [vmem:[#allocation14 + $0x30] sm:$0xff] %vm590_vm1, %v789_v63  ;;  %v771_v53 = vmul.f32 %v1123_v31, %v770_v51  ;;  %1077 = vmatmul.msk.f32.vlgmr.msra.gmra.mxu1 %vm590_vm1, %v789_v63 }
 0x267   :  { %v772_v56 = vadd.f32 %v1123_v31, %v771_v53 }
 0x269   :  { %v776_v59 = vsel %vm775_vm4, %v1123_v31, %v772_v56 }
 0x26a   :  { %v781_v60 = vsel %vm778_vm5, %v780_v57, %v776_v59 }
 0x26b   :  { %v790_v61 = vmul.f32 %v1527_v11, %v781_v60 }
 0x26d   :  { %990 = vst.msk [vmem:[#allocation14 + $0x38] sm:$0xff] %vm590_vm1, %v790_v61  ;;  %1078 = vmatmul.msk.f32.vlgmr.msra.gmra.mxu2 %vm590_vm1, %v790_v61 }
 0x26e   :  { %1016 = dma.vmem_to_hbm [thread:$0]  %s1009_s25, 1024, %s1011_s3, [#allocation15], %s1329_s21, %s1329_s21, %s1330_s22  }
 0x2b8   :  { %v811_v6 = vpop.f32.mrf.mxu3 }
 0x2b9   :  { %975 = vst.msk [vmem:[#allocation13] sm:$0xff] %vm146_vm0, %v811_v6 }
 0x2ba   :  { %v834_v11 = vpop.f32.mrf.mxu0 }
 0x2bb   :  { %976 = vst.msk [vmem:[#allocation13 + $0x8] sm:$0xff] %vm146_vm0, %v834_v11 }
 0x2c2   :  { %v857_v37 = vpop.f32.mrf.mxu1 }
 0x2c3   :  { %977 = vst.msk [vmem:[#allocation13 + $0x10] sm:$0xff] %vm146_vm0, %v857_v37 }
 0x2d0   :  { %v880_v62 = vpop.f32.mrf.mxu2 }
 0x2d1   :  { %978 = vst.msk [vmem:[#allocation13 + $0x18] sm:$0xff] %vm146_vm0, %v880_v62 }
 0x2d8   :  { %v903_v0 = vpop.f32.mrf.mxu3 }
 0x2d9   :  { %979 = vst.msk [vmem:[#allocation13 + $0x20] sm:$0xff] %vm146_vm0, %v903_v0 }
 0x2da   :  { %v926_v1 = vpop.f32.mrf.mxu0 }
 0x2db   :  { %980 = vst.msk [vmem:[#allocation13 + $0x28] sm:$0xff] %vm146_vm0, %v926_v1 }
 0x2e2   :  { %v949_v2 = vpop.f32.mrf.mxu1 }
 0x2e3   :  { %981 = vst.msk [vmem:[#allocation13 + $0x30] sm:$0xff] %vm146_vm0, %v949_v2 }
 0x2f0   :  { %v972_v3 = vpop.f32.mrf.mxu2 }
 0x2f1   :  { %982 = vst.msk [vmem:[#allocation13 + $0x38] sm:$0xff] %vm146_vm0, %v972_v3 }
 0x2f2   :  { %1003 = dma.vmem_to_hbm [thread:$0]  %s996_s27, 1024, %s998_s30, [#allocation4], %s1329_s21, %s1329_s21, %s1330_s22  }
 0x2f3   :  { %1324 = dma.done.wait [#allocation4], 1024  }
 0x2f4   :  { %1325 = vsyncadd [#allocation4], 4294966272 }
 0x2f5   :  { %1326 = dma.done.wait [#allocation15], 1024  }
 0x2f6   :  { %1327 = vsyncadd [#allocation15], 4294966272 }
 0x2f7   :  { %1025 = vsyncpa [#allocation3], 1 }
 0x2f8   :  { %1026 = vsyncpa [#allocation6], 1 }
 0x2f9   :  { %1027 = vsyncpa [#allocation9], 1 }
 0x2fa   :  { %1028 = vsyncpa [#allocation12], 1 }
 0x2fb   :  { %1029 = vsyncpa [#allocation4], 1 }
 0x2fc   :  { %1030 = vsyncpa [#allocation15], 1 }

</bundles_post_ra>
